<compile_context>
chip_gen: v6e
topology: v6e:2x2x1
jax: 0.10.0
libtpu: 0.0.40
codegen_flags: <defaults>
</compile_context>

<pallas_src>
import functools

import jax
import jax.numpy as jnp
from jax.experimental import pallas as pl
from jax.experimental.pallas import tpu as pltpu

CLIP_MEAN = (0.48145466, 0.4578275, 0.40821073)
CLIP_STD = (0.26862954, 0.26130258, 0.27577711)


def _round_up(x: int, m: int) -> int:
  return (x + m - 1) // m * m


def _bicubic_matrix(in_size: int, out_size: int) -> jnp.ndarray:
  """(out_size, in_size) bicubic interpolation matrix, a=-0.75, half-pixel."""
  a = -0.75
  scale = in_size / out_size
  i = jnp.arange(out_size, dtype=jnp.float32)
  src = (i + 0.5) * scale - 0.5
  f = jnp.floor(src)
  t = src - f

  def cubic(x):
    x = jnp.abs(x)
    return jnp.where(
        x <= 1.0,
        (a + 2.0) * x**3 - (a + 3.0) * x**2 + 1.0,
        jnp.where(x < 2.0, a * x**3 - 5.0 * a * x**2 + 8.0 * a * x - 4.0 * a,
                  0.0),
    )

  offsets = jnp.arange(-1, 3, dtype=jnp.float32)          # 4 taps
  idx = f[:, None] + offsets[None, :]                      # (out, 4)
  w = cubic(t[:, None] - offsets[None, :])                 # (out, 4)
  idx_c = jnp.clip(idx, 0, in_size - 1).astype(jnp.int32)  # replicate border
  m = jnp.zeros((out_size, in_size), jnp.float32)
  m = m.at[jnp.arange(out_size)[:, None], idx_c].add(w)
  return m


def _transform_kernel(bias_ref, w1_hi_ref, w1_lo_ref, w2_ref, x_ref, o_ref, *,
                      w_first):
  """One (image, channel) per grid step: resize (2 matmul phases) + normalize.

  x_ref : (1, 1, Hp, Wp) uint8 (zero padded)     o_ref : (1, 1, S, S) f32
  bias_ref : (C,) f32 in SMEM  -- mean/std
  Landscape (w_first):  w1_hi/lo (Wp, S) bf16 = Ww^T hi/lo,
                        w2 (1, S, Hp) f32 = Wh * inv_std[c]/255 (per channel).
  Portrait:             w1_hi/lo (1, S, Hp) bf16 = scaled Wh hi/lo (per channel),
                        w2 (Wp, S) f32 = Ww^T.
  """
  c = pl.program_id(0)
  # uint8 values 0..255 are exactly representable in bf16.
  x = x_ref[0, 0].astype(jnp.bfloat16)                                  # (Hp, Wp)
  if w_first:
    # Phase 1 (bulk of the FLOPs): contract W at bf16 MXU rate; hi/lo weight
    # split + f32 accumulation keeps near-f32 accuracy.
    tmp = (jnp.dot(x, w1_hi_ref[...], preferred_element_type=jnp.float32) +
           jnp.dot(x, w1_lo_ref[...], preferred_element_type=jnp.float32))  # (Hp, S)
    # Phase 2 (small): contract H in f32; 1/(255*std) is folded into the
    # per-channel weight, so the epilogue is only a bias subtract.
    out = jnp.dot(w2_ref[0], tmp, preferred_element_type=jnp.float32)       # (S, S)
  else:
    tmp = (jnp.dot(w1_hi_ref[0], x, preferred_element_type=jnp.float32) +
           jnp.dot(w1_lo_ref[0], x, preferred_element_type=jnp.float32))    # (S, Wp)
    out = jnp.dot(tmp, w2_ref[...], preferred_element_type=jnp.float32)     # (S, S)
  o_ref[0, 0] = out - bias_ref[c]


@functools.partial(jax.jit, static_argnames=("image_size",))
def clip_transform(x_u8: jnp.ndarray, image_size: int) -> jnp.ndarray:
  """x_u8: uint8 NCHW image batch.  Returns float32 (N, C, S, S)."""
  n, c, h, w = x_u8.shape
  s = image_size

  # Resize: shorter edge -> image_size (torchvision semantics).
  if h <= w:
    new_h, new_w = s, int(s * w / h)
  else:
    new_h, new_w = int(s * h / w), s
  wh = _bicubic_matrix(h, new_h)                            # (new_h, h)
  ww = _bicubic_matrix(w, new_w)                            # (new_w, w)

  # CenterCrop folded into the interpolation matrices.
  top = int(round((new_h - s) / 2.0))
  left = int(round((new_w - s) / 2.0))
  wh = wh[top:top + s]                                      # (S, h)
  ww = ww[left:left + s]                                    # (S, w)

  # Pad the image to lane/sublane-friendly sizes (uint8 tile is (32, 128));
  # matching zero columns/rows in Wh / Ww^T keep the result exact.
  hp = _round_up(h, 32)
  wp = _round_up(w, 128)
  if (hp, wp) != (h, w):
    x_u8 = jnp.pad(x_u8, ((0, 0), (0, 0), (0, hp - h), (0, wp - w)))
  wh = jnp.pad(wh, ((0, 0), (0, hp - h)))                   # (S, Hp)
  wwt = jnp.pad(ww, ((0, 0), (0, wp - w))).T                # (Wp, S)

  # ConvertImageDtype + Normalize folded: per-channel scale into Wh, bias out.
  inv_std = 1.0 / jnp.asarray(CLIP_STD, jnp.float32)        # (C,)
  bias = jnp.asarray(CLIP_MEAN, jnp.float32) * inv_std      # (C,)
  wh_scaled = wh[None, :, :] * (inv_std / 255.0)[:, None, None]  # (C, S, Hp)

  # Contract the longer input axis first (fewer FLOPs); that phase runs at
  # bf16 MXU rate with hi/lo-split weights, the short phase stays f32.
  w_first = w > h
  w1 = wwt if w_first else wh_scaled
  w2 = wh_scaled if w_first else wwt
  w1_hi = w1.astype(jnp.bfloat16)
  w1_lo = (w1 - w1_hi.astype(jnp.float32)).astype(jnp.bfloat16)

  # Block specs: per-channel block for the channel-stacked weight (only one
  # channel's slice resident), constant full block for the shared Ww^T.
  chan_spec = pl.BlockSpec((1, s, hp), lambda ci, i: (ci, 0, 0))
  full_spec = pl.BlockSpec((wp, s), lambda ci, i: (0, 0))
  w1_spec, w2_spec = (full_spec, chan_spec) if w_first else (chan_spec, full_spec)

  # VMEM budget: x/out blocks (double-buffered), bf16 cast, phase-1 tmp,
  # double-buffered weight blocks, plus headroom for compiler temporaries.
  tmp_bytes = 4 * s * (hp if w_first else wp)
  est = (2 * hp * wp                      # uint8 x block, 2 buffers
         + 2 * hp * wp                    # bf16 cast of the block
         + tmp_bytes                      # phase-1 result
         + 3 * s * s * 4                  # out block (x2) + epilogue temp
         + 8 * s * (wp + hp)              # weight blocks (hi+lo bf16, f32), x2
         + (4 << 20))                     # headroom
  try:
    vmem_cap = int(pltpu.get_tpu_info().vmem_capacity_bytes)
  except Exception:  # conservative fallback = v7x physical size
    vmem_cap = 64 << 20
  vmem_limit = int(min(max(est, 16 << 20), (vmem_cap * 4) // 5))

  kernel = functools.partial(_transform_kernel, w_first=w_first)
  return pl.pallas_call(
      kernel,
      out_shape=jax.ShapeDtypeStruct((n, c, s, s), jnp.float32),
      grid_spec=pltpu.PrefetchScalarGridSpec(
          num_scalar_prefetch=0,
          grid=(c, n),   # channel-major: weight blocks change only with channel
          in_specs=[
              pl.BlockSpec(memory_space=pltpu.SMEM),                     # bias (C,)
              w1_spec,                                                   # w1 hi
              w1_spec,                                                   # w1 lo
              w2_spec,                                                   # w2
              pl.BlockSpec((1, 1, hp, wp), lambda ci, i: (i, ci, 0, 0)),  # x u8
          ],
          out_specs=pl.BlockSpec((1, 1, s, s), lambda ci, i: (i, ci, 0, 0)),
      ),
      compiler_params=pltpu.CompilerParams(
          dimension_semantics=("parallel", "parallel"),
          vmem_limit_bytes=vmem_limit),
  )(bias, w1_hi, w1_lo, w2, x_u8)


def _reference(x_u8, image_size):
  """Pure-JAX reference using the same interpolation matrices (full f32)."""
  n, c, h, w = x_u8.shape
  if h <= w:
    new_h, new_w = image_size, int(image_size * w / h)
  else:
    new_h, new_w = int(image_size * h / w), image_size
  wh = _bicubic_matrix(h, new_h)
  ww = _bicubic_matrix(w, new_w)
  top = int(round((new_h - image_size) / 2.0))
  left = int(round((new_w - image_size) / 2.0))
  wh = wh[top:top + image_size]
  ww = ww[left:left + image_size]
  img = x_u8.astype(jnp.float32) / 255.0
  out = jnp.einsum("oh,nchw,pw->ncop", wh, img, ww,
                   precision=jax.lax.Precision.HIGHEST)
  mean = jnp.asarray(CLIP_MEAN, jnp.float32)[None, :, None, None]
  std = jnp.asarray(CLIP_STD, jnp.float32)[None, :, None, None]
  return (out - mean) / std


if __name__ == "__main__":
  key = jax.random.PRNGKey(0)
  IMAGE_SIZE = 16
  N, C, H, W = 2, 3, 24, 32  # uint8 NCHW image batch (C=3, RGB)
  x = jax.random.randint(key, (N, C, H, W), 0, 256, dtype=jnp.int32).astype(
      jnp.uint8)

  out = clip_transform(x, image_size=IMAGE_SIZE)
  out = jax.block_until_ready(out)

  ref = _reference(x, IMAGE_SIZE)
  assert out.shape == (N, C, IMAGE_SIZE, IMAGE_SIZE)
  assert out.dtype == jnp.float32
  assert jnp.allclose(out, ref, atol=2e-4, rtol=2e-4), float(
      jnp.max(jnp.abs(out - ref)))
  print("KERNEL_OK")
</pallas_src>

<mosaic_0001>
module attributes {stable_mosaic.version = 11 : i64} {
  func.func private @main(%arg0: i32) attributes {dimension_semantics = [#tpu.dimension_semantics<core_parallel>], iteration_bounds = array<i64: 2>, tpu.core_type = #tpu.core_type<sc_scalar_subcore>, window_params = []} {
    return
  }
}

module attributes {stable_mosaic.version = 11 : i64} {
  func.func private @main(%arg0: i32) attributes {dimension_semantics = [#tpu.dimension_semantics<core_parallel>], iteration_bounds = array<i64: 2>, tpu.core_type = #tpu.core_type<sc_scalar_subcore>, window_params = []} {
    return
  }
}

module attributes {stable_mosaic.version = 11 : i64} {
  func.func @_transform_kernel(%arg0: i32, %arg1: i32, %arg2: memref<3xf32, #tpu.memory_space<smem>>, %arg3: memref<128x16xbf16, #tpu.memory_space<vmem>>, %arg4: memref<128x16xbf16, #tpu.memory_space<vmem>>, %arg5: memref<1x16x32xf32, #tpu.memory_space<vmem>>, %arg6: memref<1x1x32x128xi8, #tpu.memory_space<vmem>>, %arg7: memref<1x1x16x16xf32, #tpu.memory_space<vmem>>) attributes {dimension_semantics = [#tpu.dimension_semantics<parallel>, #tpu.dimension_semantics<parallel>], iteration_bounds = array<i64: 3, 2>, scalar_prefetch = 0 : i64, scratch_operands = 0 : i64, tpu.core_type = #tpu.core_type<tc>, window_params = [{transform_indices = @transform_0, window_bounds = array<i64: 3>}, {pipeline_mode = #tpu.pipeline_mode<synchronous>, transform_indices = @transform_1, window_bounds = array<i64: 128, 16>}, {pipeline_mode = #tpu.pipeline_mode<synchronous>, transform_indices = @transform_2, window_bounds = array<i64: 128, 16>}, {transform_indices = @transform_3, window_bounds = array<i64: 1, 16, 32>}, {transform_indices = @transform_4, window_bounds = array<i64: 1, 1, 32, 128>}, {transform_indices = @transform_5, window_bounds = array<i64: 1, 1, 16, 16>}]} {
    %c0 = arith.constant 0 : index
    %c0_0 = arith.constant 0 : index
    %c0_1 = arith.constant 0 : index
    %c0_2 = arith.constant 0 : index
    %0 = vector.load %arg6[%c0, %c0_0, %c0_1, %c0_2] : memref<1x1x32x128xi8, #tpu.memory_space<vmem>>, vector<1x1x32x128xi8>
    %1 = vector.shape_cast %0 : vector<1x1x32x128xi8> to vector<32x128xi8>
    %2 = arith.uitofp %1 : vector<32x128xi8> to vector<32x128xbf16>
    %c0_3 = arith.constant 0 : index
    %c0_4 = arith.constant 0 : index
    %3 = vector.load %arg3[%c0_3, %c0_4] : memref<128x16xbf16, #tpu.memory_space<vmem>>, vector<128x16xbf16>
    %cst = arith.constant dense<0.000000e+00> : vector<32x16xf32>
    %4 = tpu.matmul %2, %3, %cst {dimension_numbers = #tpu.dot_dimension_numbers<[1], [0], [0], [1], [0, 0, 1, 1], [], []>} : vector<32x128xbf16>, vector<128x16xbf16>, vector<32x16xf32> -> vector<32x16xf32>
    %c0_5 = arith.constant 0 : index
    %c0_6 = arith.constant 0 : index
    %5 = vector.load %arg4[%c0_5, %c0_6] : memref<128x16xbf16, #tpu.memory_space<vmem>>, vector<128x16xbf16>
    %cst_7 = arith.constant dense<0.000000e+00> : vector<32x16xf32>
    %6 = tpu.matmul %2, %5, %cst_7 {dimension_numbers = #tpu.dot_dimension_numbers<[1], [0], [0], [1], [0, 0, 1, 1], [], []>} : vector<32x128xbf16>, vector<128x16xbf16>, vector<32x16xf32> -> vector<32x16xf32>
    %7 = arith.addf %4, %6 : vector<32x16xf32>
    %c0_8 = arith.constant 0 : index
    %c0_9 = arith.constant 0 : index
    %c0_10 = arith.constant 0 : index
    %8 = vector.load %arg5[%c0_8, %c0_9, %c0_10] : memref<1x16x32xf32, #tpu.memory_space<vmem>>, vector<1x16x32xf32>
    %9 = vector.shape_cast %8 : vector<1x16x32xf32> to vector<16x32xf32>
    %cst_11 = arith.constant dense<0.000000e+00> : vector<16x16xf32>
    %10 = tpu.matmul %9, %7, %cst_11 {dimension_numbers = #tpu.dot_dimension_numbers<[1], [0], [0], [1], [0, 0, 1, 1], [], []>} : vector<16x32xf32>, vector<32x16xf32>, vector<16x16xf32> -> vector<16x16xf32>
    %11 = arith.index_cast %arg0 : i32 to index
    %12 = memref.load %arg2[%11] : memref<3xf32, #tpu.memory_space<smem>>
    %13 = vector.broadcast %12 : f32 to vector<16x16xf32>
    %14 = arith.subf %10, %13 : vector<16x16xf32>
    %c0_12 = arith.constant 0 : index
    %c0_13 = arith.constant 0 : index
    %c0_14 = arith.constant 0 : index
    %c0_15 = arith.constant 0 : index
    %15 = vector.load %arg7[%c0_12, %c0_13, %c0_14, %c0_15] : memref<1x1x16x16xf32, #tpu.memory_space<vmem>>, vector<1x1x16x16xf32>
    %16 = vector.shape_cast %15 : vector<1x1x16x16xf32> to vector<16x16xf32>
    %17 = vector.shape_cast %14 : vector<16x16xf32> to vector<1x1x16x16xf32>
    tpu.vector_store %arg7[%c0_12, %c0_13, %c0_14, %c0_15], %17 {strides = array<i32>} : memref<1x1x16x16xf32, #tpu.memory_space<vmem>>, vector<1x1x16x16xf32>,
    return
  }
  func.func @transform_0(%arg0: i32, %arg1: i32) -> i32 {
    %c0_i32 = arith.constant 0 : i32
    %c0_i32_0 = arith.constant 0 : i32
    return %c0_i32 : i32
  }
  func.func @transform_1(%arg0: i32, %arg1: i32) -> (i32, i32) {
    %c0_i32 = arith.constant 0 : i32
    %c0_i32_0 = arith.constant 0 : i32
    %c0_i32_1 = arith.constant 0 : i32
    return %c0_i32, %c0_i32_0 : i32, i32
  }
  func.func @transform_2(%arg0: i32, %arg1: i32) -> (i32, i32) {
    %c0_i32 = arith.constant 0 : i32
    %c0_i32_0 = arith.constant 0 : i32
    %c0_i32_1 = arith.constant 0 : i32
    return %c0_i32, %c0_i32_0 : i32, i32
  }
  func.func @transform_3(%arg0: i32, %arg1: i32) -> (i32, i32, i32) {
    %c0_i32 = arith.constant 0 : i32
    %c0_i32_0 = arith.constant 0 : i32
    %c0_i32_1 = arith.constant 0 : i32
    return %arg0, %c0_i32, %c0_i32_0 : i32, i32, i32
  }
  func.func @transform_4(%arg0: i32, %arg1: i32) -> (i32, i32, i32, i32) {
    %c0_i32 = arith.constant 0 : i32
    %c0_i32_0 = arith.constant 0 : i32
    %c0_i32_1 = arith.constant 0 : i32
    return %arg1, %arg0, %c0_i32, %c0_i32_0 : i32, i32, i32, i32
  }
  func.func @transform_5(%arg0: i32, %arg1: i32) -> (i32, i32, i32, i32) {
    %c0_i32 = arith.constant 0 : i32
    %c0_i32_0 = arith.constant 0 : i32
    %c0_i32_1 = arith.constant 0 : i32
    return %arg1, %arg0, %c0_i32, %c0_i32_0 : i32, i32, i32, i32
  }
}

</mosaic_0001>

<bundles_post_ra>
// kernel: clip_transform.1
= control target key start
LH: loop header
LB: loop body
LE: loop exit
PB: predicated region body
PF: predicated region fallthrough
CT: control target
= control target key end

     0   :  { %10 = vsyncpa [#allocation4], 0  ;;  %s1304_s0 = inlined_call_operand.vmem [shape: f32[3], index: 0, kind: input, shape index: {}]   ;;  %s1305_s1 = inlined_call_operand.vmem [shape: bf16[128,16], index: 1, kind: input, shape index: {}]   ;;  %s1306_s2 = inlined_call_operand.vmem [shape: bf16[128,16], index: 2, kind: input, shape index: {}]   ;;  %s1307_s3 = inlined_call_operand.vmem [shape: f32[3,16,32], index: 3, kind: input, shape index: {}]   ;;  %s1308_s4 = inlined_call_operand.vmem [shape: u8[2,3,32,128], index: 4, kind: input, shape index: {}]   ;;  %s1309_s5 = inlined_call_operand.hbm [shape: f32[2,3,16,16], index: 5, kind: output, shape index: {}]  }
   0x1   :  { %11 = vsyncpa [#allocation3], 0 }
   0x2   :  { %13 = vsyncpa [#allocation3 + $0x1], 0  ;;  %s1086_s18 = smov 0   ;;  %s1088_s19 = smov 0  }
   0x3   :  { %s1090_s20 = smov 0   ;;  %s1092_s21 = smov 0  }
   0x4   :  { %s1094_s22 = smov 0   ;;  %s1096_s23 = smov 0  }
   0x5   :  { %s1098_s24 = smov 0   ;;  %s1100_s25 = smov 0  }
   0x6 LB: > { %s725_s26 = sadd.s32 4294967295, %s1050_s25   ;;  %s726_s27 = sadd.s32 4294967294, %s1050_s25   ;;  %s1050_s25 = sphi %s1100_s25, %s19_s25   ;;  %s1046_s24 = sphi %s1098_s24, %s1321_s24   ;;  %s1042_s23 = sphi %s1096_s23, %s1320_s23   ;;  %s1038_s22 = sphi %s1094_s22, %s1319_s22   ;;  %s1034_s21 = sphi %s1092_s21, %s1318_s21   ;;  %s1030_s20 = sphi %s1090_s20, %s1317_s20   ;;  %s1026_s19 = sphi %s1088_s19, %s1316_s19   ;;  %s1022_s18 = sphi %s1086_s18, %s1315_s18  }
   0x7   : > { %s28_s28 = sadd.s32 1, %s1042_s23  ;;  %s31_s29 = sadd.s32 1, %s1046_s24 }
   0x8   : > { %p29_p0 = scmp.ge.s32.totalorder %s28_s28, 2  ;;  %s157_s30 = sadd.s32 1, %s1030_s20 }
   0x9   : > { %p167_p1 = scmp.ne.s32.totalorder %s1030_s20, %s1026_s19  ;;  %p168_p2 = scmp.eq.s32.totalorder %s725_s26, 5 }
   0xa   : > { %s1323_s28 = smov (%p29_p0, %s28_s28), 0  ;;  %s1325_s29 = smov (!%p29_p0, %s31_s29), %s1046_s24 }
   0xb   : > { %s152_s6 = ssub.s32 %s1042_s23, %s1323_s28  ;;  %p1138_p3 = por %p168_p2, %p167_p1 }
   0xc   : > { %p33_p4 = scmp.ge.s32.totalorder %s1325_s29, 3  ;;  %p173_p5 = scmp.ne.s32.totalorder %s1026_s19, %s1022_s18 }
   0xd   : > { %p174_p6 = scmp.eq.s32.totalorder %s726_s27, 5  ;;  %p727_p7 = scmp.ge.s32.totalorder %s1050_s25, 1 }
   0xe   : > { %s1327_s29 = smov (%p33_p4, %s1325_s29), 0  ;;  %p181_p9 = scmp.lt.s32.totalorder %s1050_s25, 7 }
   0xf   : > { %p1147_p8 = por %p174_p6, %p173_p5  ;;  %s153_s9 = ssub.s32 %s1046_s24, %s1327_s29 }
  0x10   : > { %s154_s10 = sor.u32 %s153_s9, %s152_s6  ;;  %p1154_p10 = pnand %p727_p7, %p181_p9 }
  0x11   : > { %s1311_s8 = scalar_select %p1147_p8, 1, 0 }
  0x12   : > { %p155_p11 = scmp.eq.s32.totalorder %s154_s10, 0  ;;  %p1158_p12 = scmp.eq.s32.totalorder %s725_s26, 0 }
  0x13   : > { %p845_p13 = pneg %p1154_p10  ;;  %s194_s15 = sshll.u32 %s1304_s0, 4  ;;  %s195_s15 = int_to_ptr.vmem [resolvable:$true] %s194_s15 }
  0x14   : > { %s1168_s16 = scalar_select %p155_p11, %s1030_s20, %s157_s30  }
  0x15   : > { %p846_p0 = pnand %p1158_p12, %p845_p13  ;;  %s939_s17 = scalar_lea.vmem %s195_s15, 16 }
  0x16   : > { %p940_p1 = scmp.ne.s32.totalorder %s195_s15, %s939_s17  ;;  %p947_p6 = scmp.lt.s32.totalorder %s195_s15, %s195_s15 }
  0x17   : > { %p941_p2 = pneg %p846_p0  ;;  %p948_p7 = scmp.lt.s32.totalorder %s939_s17, %s939_s17 }
  0x19   : > { %p942_p4 = pnand %p941_p2, %p940_p1  ;;  %p949_p9 = por %p948_p7, %p947_p6 }
  0x1b   : > { %p943_p5 = pneg %p942_p4 }
  0x1d   : > { %p950_p8 = pnand %p949_p9, %p943_p5 }
  0x1f   : > { %953 = shalt.err (!%p950_p8)
}
  0x20   : > { %s1052_s26 = smov [#allocation2]   ;;  %232 = sbr.rel (%p1154_p10) target bundleno = 492 (0x1ec), region = 40 }
  0x21   : > { %848 = dma.vmem_to_smem (!%p846_p0), %s195_s15, 16, %s1052_s26, [#allocation4]  }
  0x25   : > { %1013 = dma.done.wait (%p1158_p12), [#allocation4], 16  }
  0x26   : > { %1015 = vsyncadd (%p1158_p12), [#allocation4], 4294967280 }
  0x27   : > { %238 = sfence }
  0x28   : > { %v923_v0 = vld [vmem:[%s1306_s2 + $0x38] sm:$0xff]   ;;  %p269_p8 = scmp.lt.s32.totalorder %s1038_s22, 2  ;;  %p274_p10 = scmp.lt.s32.totalorder %s1034_s21, 1  ;;  %v925_v2 = vld [vmem:[%s1306_s2 + $0x30] sm:$0xff]   ;;  %v927_v4 = vld [vmem:[%s1306_s2 + $0x28] sm:$0xff]   ;;  %vm514_vm0 = vcmask 261120  }
  0x29   : > { %v924_v1 = vld [vmem:[%s1305_s1 + $0x38] sm:$0xff]   ;;  %786 = vmatprep.subr.bf16.mxu0 %v923_v0  ;;  %v926_v3 = vld [vmem:[%s1305_s1 + $0x30] sm:$0xff]   ;;  %v928_v5 = vld [vmem:[%s1305_s1 + $0x28] sm:$0xff]   ;;  %s838_s30 = smul.u32 6, %s1034_s21  ;;  %vm600_vm1 = vcmask 130048  }
  0x2a   : > { %s1190_s12 = scalar_select %p269_p8, %s1038_s22, 2  ;;  %806 = vmatprep.subr.bf16.mxu1 %v924_v1  ;;  %787 = vmatpush3.bf16.msra.mxu0 %v923_v0  ;;  %v929_v6 = vld [vmem:[%s1306_s2 + $0x20] sm:$0xff]   ;;  %v931_v8 = vld [vmem:[%s1306_s2 + $0x18] sm:$0xff]   ;;  %v933_v10 = vld [vmem:[%s1306_s2 + $0x10] sm:$0xff]  }
  0x2b   : > { %s275_s15 = scalar_select %p274_p10, %s1034_s21, 1  ;;  %807 = vmatpush3.bf16.msra.mxu1 %v924_v1  ;;  %788 = vmatprep.subr.bf16.mxu0 %v925_v2  ;;  %v930_v7 = vld [vmem:[%s1305_s1 + $0x20] sm:$0xff]   ;;  %v932_v9 = vld [vmem:[%s1305_s1 + $0x18] sm:$0xff]   ;;  %v934_v12 = vld [vmem:[%s1305_s1 + $0x10] sm:$0xff]  }
  0x2c   : > { %808 = vmatprep.subr.bf16.mxu1 %v926_v3  ;;  %v935_v14 = vld [vmem:[%s1306_s2 + $0x8] sm:$0xff]   ;;  %v937_v16 = vld [vmem:[%s1306_s2] sm:$0xff]   ;;  %s759_s13 = sshll.u32 %s1190_s12, 4 }
  0x2d   : > { %s837_s6 = smul.u32 3, %s275_s15  ;;  %v936_v15 = vld [vmem:[%s1305_s1 + $0x8] sm:$0xff]   ;;  %v938_v17 = vld [vmem:[%s1305_s1] sm:$0xff]   ;;  %s273_s27 = scalar_lea.vmem %s1307_s3, %s759_s13 }
  0x2e   : > { %789 = vmatpush3.bf16.msra.mxu0 %v925_v2  ;;  %v512_v19 = vld [vmem:[%s273_s27] sm:$0xff]  ;;  %v513_v32 = vld [vmem:[%s273_s27 + $0x8] sm:$0xff] }
  0x2f   : > { %s279_s9 = sadd.s32 %s837_s6, %s1190_s12  ;;  %809 = vmatpush3.bf16.msra.mxu1 %v926_v3  ;;  %790 = vmatprep.subr.bf16.mxu0 %v927_v4  ;;  %s266_s12 = sand.u32 1, %s1026_s19  }
  0x30   : > { %810 = vmatprep.subr.bf16.mxu1 %v928_v5  ;;  %s735_s17 = sshll.u32 %s279_s9, 3  ;;  %s732_s15 = sshll.u32 %s266_s12, 4 }
  0x31   : > { %s281_s11 = scalar_lea.vmem %s1308_s4, %s735_s17  ;;  %s596_s17 = sld [smem:[#allocation2 + %s1038_s22]] }
  0x32   : > { %791 = vmatpush3.bf16.msra.mxu0 %v927_v4  ;;  %v283_v11 = vld [vmem:[%s281_s11] sm:$0xff]  ;;  %s755_s6 = sshll.u32 %s1038_s22, 1  ;;  %s268_s11 = scalar_lea.vmem [#allocation5], %s732_s15 }
  0x33   : > { %811 = vmatpush3.bf16.msra.mxu1 %v928_v5  ;;  %792 = vmatprep.subr.bf16.mxu0 %v929_v6  ;;  %v284_v13 = vunpack.c.l.u8.bf16 %v283_v11  ;;  %v285_v18 = vunpack.c.h.u8.bf16 %v283_v11  ;;  %s616_s10 = sadd.s32 %s838_s30, %s755_s6  ;;  %s619_s9 = sshll.u32 %s268_s11, 4  ;;  %s1246_s9 = int_to_ptr.vmem [resolvable:$true] %s619_s9 }
  0x34   : > { %812 = vmatprep.subr.bf16.mxu1 %v930_v7  ;;  %s756_s13 = sshll.u32 %s616_s10, 7  ;;  %s1253_s26 = scalar_lea.sflag [#allocation3], %s266_s12 }
  0x35   : > { %802 = vmatprep.mubr.bf16.mxu0 %v284_v13  ;;  %822 = vmatprep.mubr.bf16.mxu1 %v284_v13  ;;  %s1251_s22 = scalar_lea.hbm %s1309_s5, %s756_s13  ;;  %s954_s27 = scalar_lea.vmem %s1246_s9, 256 }
  0x36   : > { %793 = vmatpush3.bf16.msra.mxu0 %v929_v6  ;;  %p955_p11 = scmp.ne.s32.totalorder %s1246_s9, %s954_s27 }
  0x37   : > { %813 = vmatpush3.bf16.msra.mxu1 %v930_v7  ;;  %794 = vmatprep.subr.bf16.mxu0 %v931_v8  ;;  %v597_v33 = vstv %s596_s17  ;;  %s1053_s17 = smov [#allocation5]  }
  0x38   : > { %814 = vmatprep.subr.bf16.mxu1 %v932_v9  ;;  %p956_p12 = pnand %p955_p11, %p1138_p3  ;;  %s958_s15 = sshll.u32 %s1053_s17, 4  ;;  %s959_s15 = int_to_ptr.vmem [resolvable:$false] %s958_s15 }
  0x39   : > { %s960_s30 = scalar_lea.vmem %s959_s15, 512  ;;  %p961_p0 = scmp.lt.s32.totalorder %s1246_s9, %s959_s15 }
  0x3a   : > { %795 = vmatpush3.bf16.msra.mxu0 %v931_v8  ;;  %p957_p13 = pneg %p956_p12  ;;  %p962_p1 = scmp.lt.s32.totalorder %s960_s30, %s954_s27 }
  0x3b   : > { %815 = vmatpush3.bf16.msra.mxu1 %v932_v9  ;;  %796 = vmatprep.subr.bf16.mxu0 %v933_v10 }
  0x3c   : > { %816 = vmatprep.subr.bf16.mxu1 %v934_v12  ;;  %p963_p2 = por %p962_p1, %p961_p0 }
  0x3e   : > { %797 = vmatpush3.bf16.msra.mxu0 %v933_v10  ;;  %p964_p4 = pnand %p963_p2, %p957_p13 }
  0x3f   : > { %817 = vmatpush3.bf16.msra.mxu1 %v934_v12  ;;  %798 = vmatprep.subr.bf16.mxu0 %v935_v14 }
  0x40   : > { %818 = vmatprep.subr.bf16.mxu1 %v936_v15 }
  0x42   : > { %799 = vmatpush3.bf16.msra.mxu0 %v935_v14 }
  0x43   : > { %819 = vmatpush3.bf16.msra.mxu1 %v936_v15  ;;  %800 = vmatprep.subr.bf16.mxu0 %v937_v16 }
  0x44   : > { %820 = vmatprep.subr.bf16.mxu1 %v938_v17 }
  0x46   : > { %801 = vmatpush3.bf16.msra.mxu0 %v937_v16 }
  0x47   : > { %821 = vmatpush3.bf16.msra.mxu1 %v938_v17 }
  0x49   : > { %803 = vmatmul.mubr.bf16.vlgmr.msra.gmra.mxu0 %v285_v18 }
  0x4a   : > { %823 = vmatmul.mubr.bf16.vlgmr.msra.gmra.mxu1 %v285_v18  ;;  %834 = vmatprep.mubr.msk.f32.mxu0 %vm514_vm0, %v512_v19 }
 0x109   : > { %v804_v20 = vpop.f32.mrf.mxu0 }
 0x10a   : > { %v824_v21 = vpop.f32.mrf.mxu1 }
 0x10b   : > { %v400_v22 = vpop.f32.mrf.mxu0  ;;  %v506_v29 = vadd.f32 %v824_v21, %v804_v20 }
 0x10c   : > { %v497_v23 = vpop.f32.mrf.mxu1 }
 0x10d   : > { %v805_v24 = vpop.f32.mrf.mxu0  ;;  %v498_v31 = vadd.f32 %v497_v23, %v400_v22 }
 0x10e   : > { %v825_v25 = vpop.f32.mrf.mxu1 }
 0x10f   : > { %v509_v26 = vadd.f32 %v825_v25, %v805_v24  ;;  %v403_v27 = vpop.f32.mrf.mxu0 }
 0x110   : > { %v500_v28 = vpop.f32.mrf.mxu1 }
 0x111   : > { %826 = vmatprep.subr.mxu0 %v509_v26  ;;  %v501_v30 = vadd.f32 %v500_v28, %v403_v27 }
 0x112   : > { %827 = vmatpush3.msra.mxu0 %v509_v26 }
 0x113   : > { %828 = vmatprep.subr.mxu0 %v506_v29 }
 0x114   : > { %829 = vmatpush3.msra.mxu0 %v506_v29 }
 0x115   : > { %830 = vmatprep.subr.mxu0 %v501_v30 }
 0x116   : > { %831 = vmatpush3.msra.mxu0 %v501_v30 }
 0x117   : > { %832 = vmatprep.subr.mxu0 %v498_v31 }
 0x118   : > { %833 = vmatpush3.msra.mxu0 %v498_v31 }
 0x119   : > { %835 = vmatmul.mubr.msk.f32.vlgmr.msra.gmra.mxu0 %vm514_vm0, %v513_v32 }
 0x1d9   : > { %v836_v34 = vpop.f32.mrf.mxu0 }
 0x1da   : > { %v599_v35 = vsub.f32 %v836_v34, %v597_v33 }
 0x1db   : > { %v587_v36 = vpop.f32.mrf.mxu0 }
 0x1dc   : > { %602 = vst.msk [vmem:[%s268_s11 + $0x8] sm:$0xff] %vm600_vm1, %v599_v35  ;;  %v598_v37 = vsub.f32 %v587_v36, %v597_v33 }
 0x1de   : > { %601 = vst.msk [vmem:[%s268_s11] sm:$0xff] %vm600_vm1, %v598_v37 }
 0x1df   : > { %967 = shalt.err (!%p964_p4)
}
 0x1e0   : > { %s968_s12 = scalar_lea.hbm %s1251_s22, 256  ;;  %s972_s11 = scalar_lea.hbm %s1309_s5, 1536 }
 0x1e1   : > { %p969_p5 = scmp.ne.s32.totalorder %s1251_s22, %s968_s12  ;;  %p973_p9 = scmp.lt.s32.totalorder %s1251_s22, %s1309_s5 }
 0x1e2   : > { %p974_p8 = scmp.lt.s32.totalorder %s972_s11, %s968_s12 }
 0x1e3   : > { %p970_p6 = pnand %p969_p5, %p1138_p3 }
 0x1e4   : > { %p975_p10 = por %p974_p8, %p973_p9 }
 0x1e5   : > { %p971_p7 = pneg %p970_p6 }
 0x1e7   : > { %p976_p11 = pnand %p975_p10, %p971_p7 }
 0x1e9   : > { %979 = shalt.err (!%p976_p11)
}
 0x1ea   : > { %s1054_s21 = smov 128   ;;  %s1055_s27 = smov 8  }
 0x1eb   : > { %843 = dma.vmem_to_hbm [thread:$0]  (%p1138_p3), %s1246_s9, 256, %s1251_s22, %s1253_s26, %s1054_s21, %s1054_s21, %s1055_s27  }
 0x1ec PF: > { %p855_p12 = scmp.ge.s32.totalorder %s1050_s25, 2  ;;  %s634_s17 = sand.u32 1, %s1022_s18  }
 0x1ed   : > { %p1314_p13 = scmp.ne.s32.totalorder %s1311_s8, 0  ;;  %s635_s15 = scalar_lea.sflag [#allocation3], %s634_s17 }
 0x1ef   : > { %p850_p0 = pnand %p855_p12, %p1314_p13 }
 0x1f1   : > { %p851_p1 = pneg %p850_p0 }
 0x1f3   : > { %1017 = dma.done.wait (%p851_p1), %s635_s15, 256  }
 0x1f4   : > { %1019 = vsyncadd (%p851_p1), %s635_s15, 4294967040  ;;  %s19_s25 = sadd.s32 1, %s1050_s25   ;;  %s1315_s18 = smov %s1026_s19 }
 0x1f5   : > { %p16_p2 = scmp.ge.s32.totalorder %s19_s25, 8   ;;  %s1316_s19 = smov %s1030_s20 }
 0x1f6   : > { %s1317_s20 = smov %s1168_s16  ;;  %s1318_s21 = smov %s1042_s23 }
 0x1f7   : > { %s1319_s22 = smov %s1046_s24  ;;  %s1320_s23 = smov %s1323_s28 }
 0x1f8   : > { %s1321_s24 = smov %s1327_s29  ;;  %18 = sbr.rel (!%p16_p2) target bundleno = 6 (0x6), region = 83 }
 0x1fd   :  { %640 = vsyncpa [#allocation3], 1 }
 0x1fe   :  { %642 = vsyncpa [#allocation3 + $0x1], 1 }
 0x1ff   :  { %643 = vsyncpa [#allocation4], 1 }
 0x200   :  { %645 = vsyncpa [#allocation4 + $0x1], 1 }

</bundles_post_ra>
